<compile_context>
chip_gen: v7x
topology: tpu7x:2x2x1
jax: 0.10.0
libtpu: 0.0.40
codegen_flags: <defaults>
</compile_context>

<pallas_src>
import functools
import math

import jax
import jax.numpy as jnp
from jax.experimental import pallas as pl
from jax.experimental.pallas import tpu as pltpu


def _round_up(x, m):
    return (x + m - 1) // m * m


def _sublane(dtype):
    # f32 -> 8, bf16 -> 16, int8/fp8 -> 32 rows per vreg.
    return max(8, 32 // jnp.dtype(dtype).itemsize)


def _vmem_capacity_bytes():
    try:
        info = pltpu.get_tpu_info()
        cap = getattr(info, "vmem_capacity_bytes", None)
        if cap:
            return int(cap)
    except Exception:
        pass
    return 64 << 20     # conservative (v7x-sized) fallback


def _conv1d_kernel(*refs, kernel_size, stride, dilation, groups, cg_pad, c_out,
                   nb, tl, hw, row_chunk):
    """One (batch-block, L_out-tile) grid step.

    refs (hw > 0):  x_ref  (NB, R, TL)               phased, channel-padded body
                    hx_ref (NB, R, hw)               halo = first hw cols of tile t+1
                    w_ref  (C_out_pad, K*cg_pad + 1) fused weight (+ bias column)
                    o_ref  (NB, C_out_pad, TL)       lane-dense output block
                    rhs_ref(K*cg_pad + 1, NB*TL)     VMEM staging scratch
    refs (hw == 0): same without hx_ref.
    R = stride*groups*cg_pad; row = phase*groups*cg_pad + group*cg_pad + channel.
    """
    if hw > 0:
        x_ref, hx_ref, w_ref, o_ref = refs[:4]
    else:
        x_ref, w_ref, o_ref = refs[:3]
        hx_ref = None
    rhs_ref = refs[-1]

    c_out_pad = o_ref.shape[1]
    opg = c_out // groups
    extra = c_out_pad - c_out           # zero-weight rows folded into the last group
    width = nb * tl
    kcg = kernel_size * cg_pad

    # Bias row: the fused weight carries the bias in its last column.  Written
    # every step (scratch is per-core; grid steps may be split across TCs).
    rhs_ref[pl.ds(kcg, 1), :] = jnp.ones((1, width), rhs_ref.dtype)

    for g in range(groups):                       # static loops (groups/K/NB small)
        # --- im2col over taps only: stage this group's fused RHS ---------------
        for kk in range(kernel_size):
            q, r = divmod(kk * dilation, stride)  # tap offset in phased coords
            src = r * groups * cg_pad + g * cg_pad
            dst = kk * cg_pad
            for b in range(nb):
                c0 = b * tl
                if q < tl:
                    rhs_ref[pl.ds(dst, cg_pad), pl.ds(c0, tl - q)] = \
                        x_ref[b, pl.ds(src, cg_pad), pl.ds(q, tl - q)]
                if q > 0:
                    rhs_ref[pl.ds(dst, cg_pad), pl.ds(c0 + tl - q, q)] = \
                        hx_ref[b, pl.ds(src, cg_pad), pl.ds(0, q)]

        # --- one deep-contraction matmul, <=row_chunk output rows per dot ------
        row0 = g * opg
        nrows = opg + (extra if g == groups - 1 else 0)
        done = 0
        while done < nrows:
            rows = min(row_chunk, nrows - done)
            acc = jnp.dot(w_ref[pl.ds(row0 + done, rows), :], rhs_ref[...],
                          preferred_element_type=jnp.float32)
            for b in range(nb):
                o_ref[b, pl.ds(row0 + done, rows), :] = \
                    acc[:, b * tl:(b + 1) * tl].astype(o_ref.dtype)
            done += rows


def conv1d_pallas(x, weight_flat, bias, *, kernel_size, stride=1, padding=0,
                  dilation=1, groups=1, l_tile=None, compute_dtype=None):
    """Matches torch Conv1d.forward semantics (padding_mode='zeros').

    x:           (N, C_in, L)
    weight_flat: (C_out, C_in//groups * kernel_size)   -- as stored by the module
    bias:        (C_out,) or None
    compute_dtype: optional MXU operand dtype (e.g. jnp.bfloat16); accumulation
                   stays in f32 and the output keeps x.dtype.
    """
    n, c_in, l = x.shape
    c_out = weight_flat.shape[0]
    k = kernel_size
    assert c_in % groups == 0 and c_out % groups == 0
    cg = c_in // groups
    out_dtype = x.dtype
    cdt = jnp.dtype(compute_dtype) if compute_dtype is not None else jnp.dtype(x.dtype)
    in_isize = cdt.itemsize
    out_isize = jnp.dtype(out_dtype).itemsize

    l_out = (l + 2 * padding - dilation * (k - 1) - 1) // stride + 1
    assert l_out >= 1, "Conv1d produces an empty output for this configuration"

    # ---- aligned shapes --------------------------------------------------------
    cg_pad = _round_up(cg, _sublane(cdt))             # per-tap channel block
    rows_in = stride * groups * cg_pad                # staged input rows
    c_out_pad = _round_up(c_out, max(_sublane(cdt), _sublane(out_dtype)))
    depth = k * cg_pad + 1                            # contraction depth (+1 bias row)
    q_max = (dilation * (k - 1)) // stride            # halo length in phased columns
    hw = _round_up(q_max, 128) if q_max > 0 else 0    # halo block width (lane multiple)

    # ---- generation-aware VMEM budget ------------------------------------------
    cap = _vmem_capacity_bytes()                      # 64 MiB v7x, 128 MiB v5e/v6e
    budget = min(int(cap * 0.7), 96 << 20)
    vmem_limit = int(max(32 << 20, min(cap - (4 << 20), budget + (8 << 20))))

    def _resident_bytes(tl_, nb_):
        body = 2 * nb_ * rows_in * tl_ * in_isize         # double-buffered body
        halo = 2 * nb_ * rows_in * hw * in_isize          # double-buffered halo
        outb = 2 * nb_ * c_out_pad * tl_ * out_isize      # double-buffered output
        wgt = 2 * c_out_pad * depth * in_isize            # resident fused weight
        rhs = depth * nb_ * tl_ * in_isize                # staging scratch
        return body + halo + outb + wgt + rhs + (2 << 20)

    # ---- lane-dense L_out tile (multiple of 128 and of hw) ---------------------
    if l_tile is None:
        l_tile = 1024
    step = max(hw, 128)
    tl = max(step, min(_round_up(l_out, step), _round_up(l_tile, step)))
    while tl > step and _resident_bytes(tl, 1) > budget:
        tl -= step
    n_lt = pl.cdiv(l_out, tl)

    # ---- fold batch into the matmul width (keep >=2 steps for v7x megacore) ----
    nb = 1
    for d in range(min(n, 8), 0, -1):
        if n % d:
            continue
        if _resident_bytes(tl, d) > budget:
            continue
        if d > 1 and (n // d) * n_lt < 2 and n * n_lt >= 2:
            continue
        nb = d
        break

    # ---- wrapper glue: zero pad, channel pad, stride-phase split ----------------
    m_cols = n_lt * tl + hw                           # staged columns (phased coords)
    l_need = m_cols * stride
    x_pad = jnp.pad(x, ((0, 0), (0, 0),
                        (padding, max(0, l_need - (l + padding)))))
    x_pad = x_pad[:, :, :l_need]
    x_g = x_pad.reshape(n, groups, cg, l_need)
    if cg_pad != cg:
        x_g = jnp.pad(x_g, ((0, 0), (0, 0), (0, cg_pad - cg), (0, 0)))
    # x_st[n, r*G*cg_pad + g*cg_pad + c, m] = x_pad[n, g*cg + c, m*stride + r]
    x_st = x_g.reshape(n, groups, cg_pad, m_cols, stride)
    x_st = jnp.transpose(x_st, (0, 4, 1, 2, 3)).reshape(n, rows_in, m_cols)
    x_st = x_st.astype(cdt)

    # ---- fused weight: tap-major columns, channel-padded, bias folded in -------
    w3 = weight_flat.reshape(c_out, cg, k)
    w3 = jnp.transpose(w3, (0, 2, 1)).astype(jnp.float32)       # (C_out, K, cg)
    if cg_pad != cg:
        w3 = jnp.pad(w3, ((0, 0), (0, 0), (0, cg_pad - cg)))
    w2 = w3.reshape(c_out, k * cg_pad)
    bcol = (jnp.zeros((c_out, 1), jnp.float32) if bias is None
            else bias.astype(jnp.float32).reshape(c_out, 1))
    w2 = jnp.concatenate([w2, bcol], axis=1)                    # (C_out, depth)
    if c_out_pad != c_out:
        w2 = jnp.pad(w2, ((0, c_out_pad - c_out), (0, 0)))
    w_fused = w2.astype(cdt)

    kernel = functools.partial(
        _conv1d_kernel, kernel_size=k, stride=stride, dilation=dilation,
        groups=groups, cg_pad=cg_pad, c_out=c_out, nb=nb, tl=tl, hw=hw,
        row_chunk=128)

    in_specs = [pl.BlockSpec((nb, rows_in, tl), lambda b, t: (b, 0, t))]
    operands = [x_st]
    if hw > 0:
        tlb = tl // hw
        in_specs.append(
            pl.BlockSpec((nb, rows_in, hw), lambda b, t: (b, 0, (t + 1) * tlb)))
        operands.append(x_st)                        # same array, halo window view
    in_specs.append(pl.BlockSpec((c_out_pad, depth), lambda b, t: (0, 0)))  # resident
    operands.append(w_fused)

    out = pl.pallas_call(
        kernel,
        out_shape=jax.ShapeDtypeStruct((n, c_out_pad, n_lt * tl), out_dtype),
        grid=(n // nb, n_lt),
        in_specs=in_specs,
        out_specs=pl.BlockSpec((nb, c_out_pad, tl), lambda b, t: (b, 0, t)),
        scratch_shapes=[pltpu.VMEM((depth, nb * tl), cdt)],
        compiler_params=pltpu.CompilerParams(
            dimension_semantics=("parallel", "parallel"),
            vmem_limit_bytes=vmem_limit),
    )(*operands)

    return out[:, :c_out, :l_out]


def _make_params(key, in_channels, out_channels, kernel_size, groups, use_bias):
    """Deterministic replica of _ConvNd.reset_parameters()."""
    fan = in_channels // groups * kernel_size
    std = 0.5 / math.sqrt(fan)
    w = jax.random.normal(key, (out_channels, fan), dtype=jnp.float32) * std
    b = jnp.zeros((out_channels,), jnp.float32) if use_bias else None
    return w, b


def _reference_conv1d(x, weight_flat, bias, *, kernel_size, stride, padding,
                      dilation, groups):
    c_out = weight_flat.shape[0]
    c_in_g = x.shape[1] // groups
    w = weight_flat.reshape(c_out, c_in_g, kernel_size)
    out = jax.lax.conv_general_dilated(
        x, w, window_strides=(stride,), padding=[(padding, padding)],
        rhs_dilation=(dilation,), dimension_numbers=("NCH", "OIH", "NCH"),
        feature_group_count=groups)
    if bias is not None:
        out = out + bias[None, :, None]
    return out


if __name__ == "__main__":
    key = jax.random.PRNGKey(0)
    kx, kw1, kw2, kw3, kw4, kw5, kb, kx4 = jax.random.split(key, 8)

    N, C_IN, L = 2, 4, 16
    x = jax.random.normal(kx, (N, C_IN, L), dtype=jnp.float32)

    # ---- config 1: Conv1d(4, 8, kernel_size=3, stride=1, padding=1), bias=True
    w1, b1 = _make_params(kw1, C_IN, 8, 3, groups=1, use_bias=True)
    out1 = conv1d_pallas(x, w1, b1, kernel_size=3, stride=1, padding=1)
    jax.block_until_ready(out1)
    ref1 = _reference_conv1d(x, w1, b1, kernel_size=3, stride=1, padding=1,
                             dilation=1, groups=1)
    assert out1.shape == ref1.shape == (N, 8, L)
    assert jnp.allclose(out1, ref1, atol=1e-5, rtol=1e-5)

    # ---- config 1b: same conv with a non-zero bias (exercises the folded bias)
    b1nz = 0.1 * jax.random.normal(kb, (8,), dtype=jnp.float32)
    out1b = conv1d_pallas(x, w1, b1nz, kernel_size=3, stride=1, padding=1)
    jax.block_until_ready(out1b)
    ref1b = _reference_conv1d(x, w1, b1nz, kernel_size=3, stride=1, padding=1,
                              dilation=1, groups=1)
    assert jnp.allclose(out1b, ref1b, atol=1e-5, rtol=1e-5)

    # ---- config 2: Conv1d(4, 8, 3, padding=2, dilation=2, groups=2, bias=False)
    w2, b2 = _make_params(kw2, C_IN, 8, 3, groups=2, use_bias=False)
    out2 = conv1d_pallas(x, w2, b2, kernel_size=3, stride=1, padding=2,
                         dilation=2, groups=2)
    jax.block_until_ready(out2)
    ref2 = _reference_conv1d(x, w2, b2, kernel_size=3, stride=1, padding=2,
                             dilation=2, groups=2)
    assert out2.shape == ref2.shape
    assert jnp.allclose(out2, ref2, atol=1e-5, rtol=1e-5)

    # ---- config 3: Conv1d(4, 6, 3, stride=2, padding=1), bias=True
    # exercises the stride phase decomposition and the C_out->8 sublane padding.
    w3, b3 = _make_params(kw3, C_IN, 6, 3, groups=1, use_bias=True)
    out3 = conv1d_pallas(x, w3, b3, kernel_size=3, stride=2, padding=1)
    jax.block_until_ready(out3)
    ref3 = _reference_conv1d(x, w3, b3, kernel_size=3, stride=2, padding=1,
                             dilation=1, groups=1)
    assert out3.shape == ref3.shape
    assert jnp.allclose(out3, ref3, atol=1e-5, rtol=1e-5)

    # ---- config 4: Conv1d(4, 8, kernel_size=1) -- exercises the no-halo path
    w4, b4 = _make_params(kw4, C_IN, 8, 1, groups=1, use_bias=True)
    out4 = conv1d_pallas(x, w4, b4, kernel_size=1)
    jax.block_until_ready(out4)
    ref4 = _reference_conv1d(x, w4, b4, kernel_size=1, stride=1, padding=0,
                             dilation=1, groups=1)
    assert out4.shape == ref4.shape
    assert jnp.allclose(out4, ref4, atol=1e-5, rtol=1e-5)

    # ---- config 5: batch=4 -- exercises folding NB=2 samples per grid step
    x4 = jax.random.normal(kx4, (4, C_IN, 32), dtype=jnp.float32)
    w5, b5 = _make_params(kw5, C_IN, 8, 3, groups=1, use_bias=True)
    out5 = conv1d_pallas(x4, w5, b5, kernel_size=3, stride=1, padding=1)
    jax.block_until_ready(out5)
    ref5 = _reference_conv1d(x4, w5, b5, kernel_size=3, stride=1, padding=1,
                             dilation=1, groups=1)
    assert out5.shape == ref5.shape == (4, 8, 32)
    assert jnp.allclose(out5, ref5, atol=1e-5, rtol=1e-5)

    # ---- optional bf16-operand fast path (f32 accumulation) ---------------------
    out1_bf16 = conv1d_pallas(x, w1, b1nz, kernel_size=3, stride=1, padding=1,
                              compute_dtype=jnp.bfloat16)
    jax.block_until_ready(out1_bf16)
    assert jnp.allclose(out1_bf16, ref1b, atol=5e-2, rtol=5e-2)

    print("KERNEL_OK")
</pallas_src>

<mosaic_0001>
module attributes {stable_mosaic.version = 11 : i64} {
  func.func @_conv1d_kernel(%arg0: i32, %arg1: i32, %arg2: memref<1x8x128xf32, #tpu.memory_space<vmem>>, %arg3: memref<1x8x128xf32, #tpu.memory_space<vmem>>, %arg4: memref<8x25xf32, #tpu.memory_space<vmem>>, %arg5: memref<1x8x128xf32, #tpu.memory_space<vmem>>, %arg6: memref<25x128xf32, #tpu.memory_space<vmem>>) attributes {dimension_semantics = [#tpu.dimension_semantics<parallel>, #tpu.dimension_semantics<parallel>], iteration_bounds = array<i64: 2, 1>, scalar_prefetch = 0 : i64, scratch_operands = 1 : i64, tpu.core_type = #tpu.core_type<tc>, window_params = [{transform_indices = @transform_0, window_bounds = array<i64: 1, 8, 128>}, {transform_indices = @transform_1, window_bounds = array<i64: 1, 8, 128>}, {pipeline_mode = #tpu.pipeline_mode<synchronous>, transform_indices = @transform_2, window_bounds = array<i64: 8, 25>}, {transform_indices = @transform_3, window_bounds = array<i64: 1, 8, 128>}]} {
    %cst = arith.constant 1.000000e+00 : f32
    %0 = vector.broadcast %cst : f32 to vector<1x128xf32>
    %c24 = arith.constant 24 : index
    %c0 = arith.constant 0 : index
    %1 = vector.load %arg6[%c24, %c0] : memref<25x128xf32, #tpu.memory_space<vmem>>, vector<1x128xf32>
    tpu.vector_store %arg6[%c24, %c0], %0 {strides = array<i32>} : memref<25x128xf32, #tpu.memory_space<vmem>>, vector<1x128xf32>,
    %c0_0 = arith.constant 0 : index
    %c0_1 = arith.constant 0 : index
    %c0_2 = arith.constant 0 : index
    %2 = vector.load %arg2[%c0_0, %c0_1, %c0_2] : memref<1x8x128xf32, #tpu.memory_space<vmem>>, vector<1x8x128xf32>
    %3 = vector.shape_cast %2 : vector<1x8x128xf32> to vector<8x128xf32>
    %c0_3 = arith.constant 0 : index
    %c0_4 = arith.constant 0 : index
    %4 = vector.load %arg6[%c0_3, %c0_4] : memref<25x128xf32, #tpu.memory_space<vmem>>, vector<8x128xf32>
    tpu.vector_store %arg6[%c0_3, %c0_4], %3 {strides = array<i32>} : memref<25x128xf32, #tpu.memory_space<vmem>>, vector<8x128xf32>,
    %c0_5 = arith.constant 0 : index
    %c0_6 = arith.constant 0 : index
    %c1 = arith.constant 1 : index
    %5 = vector.load %arg2[%c0_5, %c0_6, %c1] : memref<1x8x128xf32, #tpu.memory_space<vmem>>, vector<1x8x127xf32>
    %6 = vector.shape_cast %5 : vector<1x8x127xf32> to vector<8x127xf32>
    %c8 = arith.constant 8 : index
    %c0_7 = arith.constant 0 : index
    %7 = vector.load %arg6[%c8, %c0_7] : memref<25x128xf32, #tpu.memory_space<vmem>>, vector<8x127xf32>
    tpu.vector_store %arg6[%c8, %c0_7], %6 {strides = array<i32>} : memref<25x128xf32, #tpu.memory_space<vmem>>, vector<8x127xf32>,
    %c0_8 = arith.constant 0 : index
    %c0_9 = arith.constant 0 : index
    %c0_10 = arith.constant 0 : index
    %8 = vector.load %arg3[%c0_8, %c0_9, %c0_10] : memref<1x8x128xf32, #tpu.memory_space<vmem>>, vector<1x8x1xf32>
    %9 = vector.shape_cast %8 : vector<1x8x1xf32> to vector<8x1xf32>
    %c8_11 = arith.constant 8 : index
    %c127 = arith.constant 127 : index
    %10 = vector.load %arg6[%c8_11, %c127] : memref<25x128xf32, #tpu.memory_space<vmem>>, vector<8x1xf32>
    tpu.vector_store %arg6[%c8_11, %c127], %9 {strides = array<i32>} : memref<25x128xf32, #tpu.memory_space<vmem>>, vector<8x1xf32>,
    %c0_12 = arith.constant 0 : index
    %c0_13 = arith.constant 0 : index
    %c2 = arith.constant 2 : index
    %11 = vector.load %arg2[%c0_12, %c0_13, %c2] : memref<1x8x128xf32, #tpu.memory_space<vmem>>, vector<1x8x126xf32>
    %12 = vector.shape_cast %11 : vector<1x8x126xf32> to vector<8x126xf32>
    %c16 = arith.constant 16 : index
    %c0_14 = arith.constant 0 : index
    %13 = vector.load %arg6[%c16, %c0_14] : memref<25x128xf32, #tpu.memory_space<vmem>>, vector<8x126xf32>
    tpu.vector_store %arg6[%c16, %c0_14], %12 {strides = array<i32>} : memref<25x128xf32, #tpu.memory_space<vmem>>, vector<8x126xf32>,
    %c0_15 = arith.constant 0 : index
    %c0_16 = arith.constant 0 : index
    %c0_17 = arith.constant 0 : index
    %14 = vector.load %arg3[%c0_15, %c0_16, %c0_17] : memref<1x8x128xf32, #tpu.memory_space<vmem>>, vector<1x8x2xf32>
    %15 = vector.shape_cast %14 : vector<1x8x2xf32> to vector<8x2xf32>
    %c16_18 = arith.constant 16 : index
    %c126 = arith.constant 126 : index
    %16 = vector.load %arg6[%c16_18, %c126] : memref<25x128xf32, #tpu.memory_space<vmem>>, vector<8x2xf32>
    tpu.vector_store %arg6[%c16_18, %c126], %15 {strides = array<i32>} : memref<25x128xf32, #tpu.memory_space<vmem>>, vector<8x2xf32>,
    %c0_19 = arith.constant 0 : index
    %c0_20 = arith.constant 0 : index
    %17 = vector.load %arg4[%c0_19, %c0_20] : memref<8x25xf32, #tpu.memory_space<vmem>>, vector<8x25xf32>
    %c0_21 = arith.constant 0 : index
    %c0_22 = arith.constant 0 : index
    %18 = vector.load %arg6[%c0_21, %c0_22] : memref<25x128xf32, #tpu.memory_space<vmem>>, vector<25x128xf32>
    %cst_23 = arith.constant dense<0.000000e+00> : vector<8x128xf32>
    %19 = tpu.matmul %17, %18, %cst_23 {dimension_numbers = #tpu.dot_dimension_numbers<[1], [0], [0], [1], [0, 0, 1, 1], [], []>} : vector<8x25xf32>, vector<25x128xf32>, vector<8x128xf32> -> vector<8x128xf32>
    %c0_24 = arith.constant 0 : index
    %c0_25 = arith.constant 0 : index
    %c0_26 = arith.constant 0 : index
    %20 = vector.load %arg5[%c0_24, %c0_25, %c0_26] : memref<1x8x128xf32, #tpu.memory_space<vmem>>, vector<1x8x128xf32>
    %21 = vector.shape_cast %20 : vector<1x8x128xf32> to vector<8x128xf32>
    %22 = vector.shape_cast %19 : vector<8x128xf32> to vector<1x8x128xf32>
    tpu.vector_store %arg5[%c0_24, %c0_25, %c0_26], %22 {strides = array<i32>} : memref<1x8x128xf32, #tpu.memory_space<vmem>>, vector<1x8x128xf32>,
    return
  }
  func.func @transform_0(%arg0: i32, %arg1: i32) -> (i32, i32, i32) {
    %c0_i32 = arith.constant 0 : i32
    %c0_i32_0 = arith.constant 0 : i32
    return %arg0, %c0_i32, %arg1 : i32, i32, i32
  }
  func.func @transform_1(%arg0: i32, %arg1: i32) -> (i32, i32, i32) {
    %c1_i32 = arith.constant 1 : i32
    %0 = arith.addi %arg1, %c1_i32 : i32
    %c1_i32_0 = arith.constant 1 : i32
    %1 = arith.muli %0, %c1_i32_0 : i32
    %c0_i32 = arith.constant 0 : i32
    %c0_i32_1 = arith.constant 0 : i32
    return %arg0, %c0_i32, %1 : i32, i32, i32
  }
  func.func @transform_2(%arg0: i32, %arg1: i32) -> (i32, i32) {
    %c0_i32 = arith.constant 0 : i32
    %c0_i32_0 = arith.constant 0 : i32
    %c0_i32_1 = arith.constant 0 : i32
    return %c0_i32, %c0_i32_0 : i32, i32
  }
  func.func @transform_3(%arg0: i32, %arg1: i32) -> (i32, i32, i32) {
    %c0_i32 = arith.constant 0 : i32
    %c0_i32_0 = arith.constant 0 : i32
    return %arg0, %c0_i32, %arg1 : i32, i32, i32
  }
}

</mosaic_0001>

<bundles_post_ra>
// kernel: tpu_custom_call.1
= control target key start
LH: loop header
LB: loop body
LE: loop exit
PB: predicated region body
PF: predicated region fallthrough
CT: control target
= control target key end

     0   :  { %s1107_s0 = inlined_call_operand.hbm [shape: f32[2,8,256], index: 0, kind: input, shape index: {}]   ;;  %s1108_s1 = inlined_call_operand.hbm [shape: f32[2,8,256], index: 1, kind: input, shape index: {}]   ;;  %s1109_s2 = inlined_call_operand.hbm [shape: f32[8,25], index: 2, kind: input, shape index: {}]   ;;  %s1110_s3 = inlined_call_operand.hbm [shape: f32[2,8,128], index: 3, kind: output, shape index: {}]  }
   0x1   :  { %1116 = sst [smem:[#allocation15_spill]] %s1109_s2 }
   0x2   :  { %8 = vsyncpa [#allocation4], 0 }
   0x3   :  { %10 = vsyncpa [#allocation4 + $0x1], 0 }
   0x4   :  { %11 = vsyncpa [#allocation7], 0 }
   0x5   :  { %13 = vsyncpa [#allocation7 + $0x1], 0 }
   0x6   :  { %14 = vsyncpa [#allocation5], 0 }
   0x7   :  { %16 = vsyncpa [#allocation5 + $0x1], 0  ;;  %s851_s12 = smov 0   ;;  %s853_s13 = smov 0  }
   0x8   :  { %s855_s14 = smov 0   ;;  %s857_s15 = smov 0  }
   0x9   :  { %s859_s16 = smov 0   ;;  %s861_s17 = smov 0  }
   0xa LB: > { %s882_s18 = sadd.s32 4294967295, %s818_s17   ;;  %s508_s19 = sadd.s32 4294967294, %s818_s17   ;;  %s818_s17 = sphi %s861_s17, %s22_s17   ;;  %s814_s16 = sphi %s859_s16, %s1140_s16   ;;  %s810_s15 = sphi %s857_s15, %s1139_s15   ;;  %s806_s14 = sphi %s855_s14, %s1138_s14   ;;  %s802_s13 = sphi %s853_s13, %s1137_s13   ;;  %s798_s12 = sphi %s851_s12, %s1136_s12  }
   0xb   : > { %p56_p0 = scmp.ne.s32.totalorder %s802_s13, %s798_s12  ;;  %p1111_p1 = scmp.eq.s32.totalorder %s882_s18, 0 }
   0xc   : > { %p139_p3 = scmp.eq.s32.totalorder %s508_s19, 1  ;;  %p509_p5 = scmp.ge.s32.totalorder %s818_s17, 1 }
   0xd   : > { %p891_p4 = por %p1111_p1, %p56_p0  ;;  %p146_p7 = scmp.lt.s32.totalorder %s818_s17, 3 }
   0xe   : > { %p896_p6 = por %p139_p3, %p56_p0  ;;  %s820_s23 = smov [#allocation8]  }
   0xf   : > { %s1117_s20 = scalar_select %p891_p4, 1, 0 }
  0x10   : > { %s1118_s21 = scalar_select %p896_p6, 1, 0 }
  0x11   : > { %p901_p8 = pnand %p509_p5, %p146_p7  ;;  %s159_s24 = sshll.u32 %s820_s23, 4  ;;  %s160_s24 = int_to_ptr.vmem [resolvable:$true] %s159_s24 }
  0x12   : > { %s34_s26 = sadd.s32 1, %s814_s16  ;;  %s43_s27 = sadd.s32 1, %s806_s14 }
  0x13   : > { %s1119_s22 = scalar_select %p901_p8, 1, 0 }
  0x14   : > { %p564_p10 = pneg %p901_p8  ;;  %p916_p12 = scmp.ge.s32.totalorder %s34_s26, 2 }
  0x15   : > { %s1122_s2 = sld [smem:[#allocation15_spill]] }
  0x16   : > { %p910_p11 = pnand %p564_p10, %p1111_p1 }
  0x17   : > { %s1121_s28 = scalar_select %p916_p12, 1, 0 }
  0x18   : > { %p641_p0 = pneg %p910_p11 }
  0x1b   : > { %s639_s4 = scalar_lea.hbm %s1122_s2, 128 }
  0x1c   : > { %p640_p13 = scmp.ne.s32.totalorder %s1122_s2, %s639_s4  ;;  %p646_p7 = scmp.lt.u32.totalorder %s639_s4, %s1122_s2 }
  0x1e   : > { %p642_p3 = pnand %p641_p0, %p640_p13 }
  0x20   : > { %p643_p5 = pneg %p642_p3 }
  0x22   : > { %p648_p10 = pnand %p646_p7, %p643_p5 }
  0x24   : > { %651 = shalt.err (!%p648_p10)
}
  0x25   : > { %s652_s9 = scalar_lea.vmem %s160_s24, 128  ;;  %p660_p6 = scmp.lt.s32.totalorder %s160_s24, %s160_s24 }
  0x26   : > { %p653_p9 = scmp.ne.s32.totalorder %s160_s24, %s652_s9  ;;  %p661_p4 = scmp.lt.s32.totalorder %s652_s9, %s652_s9 }
  0x28   : > { %p655_p1 = pnand %p653_p9, %p641_p0  ;;  %p662_p8 = por %p661_p4, %p660_p6 }
  0x2a   : > { %p656_p2 = pneg %p655_p1 }
  0x2c   : > { %p663_p12 = pnand %p662_p8, %p656_p2 }
  0x2e   : > { %666 = shalt.err (!%p663_p12)
}
  0x2f   : > { %567 = dma.hbm_to_vmem [thread:$0]  (!%p910_p11), %s1122_s2, 128, %s160_s24, [#allocation7]  }
  0x30   : > { %p1123_p1 = scmp.ne.s32.totalorder %s1121_s28, 0  ;;  %p50_p2 = scmp.ne.s32.totalorder %s806_s14, %s802_s13 }
  0x31   : > { %p51_p4 = scmp.eq.s32.totalorder %s818_s17, 0  ;;  %p580_p6 = scmp.lt.s32.totalorder %s818_s17, 2 }
  0x32   : > { %s1142_s26 = smov (%p1123_p1, %s34_s26), 0  ;;  %p1125_p12 = scmp.eq.s32.totalorder %s882_s18, 1 }
  0x33   : > { %1124 = sst [smem:[#allocation14_spill]] %s1142_s26  ;;  %s38_s19 = ssub.s32 %s814_s16, %s1142_s26 }
  0x34   : > { %p41_p8 = scmp.eq.s32.totalorder %s38_s19, 0  ;;  %p52_p9 = por %p51_p4, %p50_p2 }
  0x35   : > { %p948_p13 = por %p1125_p12, %p50_p2  ;;  %s170_s25 = sand.u32 1, %s806_s14  }
  0x36   : > { %s956_s29 = scalar_select %p41_p8, %s806_s14, %s43_s27  }
  0x37   : > { %s1126_s23 = scalar_select %p948_p13, 1, 0 }
  0x38   : > { %s958_s24 = sshll.u32 %s170_s25, 3  ;;  %s529_s28 = sshll.u32 %s814_s16, 8 }
  0x39   : > { %s964_s5 = scalar_lea.hbm %s1107_s0, %s529_s28  ;;  %s174_s6 = scalar_lea.vmem [#allocation3], %s958_s24 }
  0x3a   : > { %s183_s7 = sshll.u32 %s174_s6, 4  ;;  %p969_p11 = pnand %p580_p6, %p52_p9  ;;  %s967_s7 = int_to_ptr.vmem [resolvable:$true] %s183_s7 }
  0x3b   : > { %s976_s10 = scalar_lea.hbm %s1108_s1, %s529_s28  ;;  %s190_s11 = sand.u32 1, %s818_s17  }
  0x3c   : > { %s171_s19 = scalar_lea.sflag [#allocation4], %s170_s25  ;;  %s667_s30 = scalar_lea.hbm %s964_s5, 128 }
  0x3d   : > { %p668_p0 = scmp.ne.s32.totalorder %s964_s5, %s667_s30  ;;  %p669_p3 = pneg %p969_p11 }
  0x3e   : > { %s672_s2 = scalar_lea.hbm %s1107_s0, 512  ;;  %p673_p10 = scmp.lt.u32.totalorder %s964_s5, %s1107_s0 }
  0x3f   : > { %p670_p5 = pnand %p669_p3, %p668_p0  ;;  %p674_p1 = scmp.lt.u32.totalorder %s672_s2, %s667_s30 }
  0x40   : > { %p676_p4 = scmp.lt.u32.totalorder %s667_s30, %s964_s5 }
  0x41   : > { %p671_p7 = pneg %p670_p5  ;;  %p675_p2 = por %p674_p1, %p673_p10 }
  0x43   : > { %p677_p6 = por %p676_p4, %p675_p2 }
  0x45   : > { %p678_p8 = pnand %p677_p6, %p671_p7 }
  0x47   : > { %681 = shalt.err (!%p678_p8)
}
  0x48   : > { %s682_s25 = scalar_lea.vmem %s967_s7, 128  ;;  %s821_s28 = smov [#allocation3]  }
  0x49   : > { %p683_p9 = scmp.ne.s32.totalorder %s967_s7, %s682_s25  ;;  %s687_s9 = sshll.u32 %s821_s28, 4  ;;  %s688_s9 = int_to_ptr.vmem [resolvable:$false] %s687_s9 }
  0x4a   : > { %s689_s26 = scalar_lea.vmem %s688_s9, 256  ;;  %p690_p5 = scmp.lt.s32.totalorder %s967_s7, %s688_s9 }
  0x4b   : > { %p685_p12 = pnand %p683_p9, %p669_p3  ;;  %p691_p10 = scmp.lt.s32.totalorder %s689_s26, %s682_s25 }
  0x4d   : > { %p686_p0 = pneg %p685_p12  ;;  %p692_p1 = por %p691_p10, %p690_p5 }
  0x4f   : > { %p693_p2 = pnand %p692_p1, %p686_p0 }
  0x51   : > { %696 = shalt.err (!%p693_p2)
}
  0x52   : > { %571 = dma.hbm_to_vmem [thread:$0]  (!%p969_p11), %s964_s5, 128, %s967_s7, %s171_s19  }
  0x53   : > { %s1005_s2 = scalar_lea.hbm %s976_s10, 128  ;;  %s194_s30 = scalar_lea.vmem [#allocation6], %s958_s24 }
  0x54   : > { %s204_s4 = sshll.u32 %s194_s30, 4  ;;  %s191_s6 = scalar_lea.sflag [#allocation7], %s190_s11  ;;  %s205_s4 = int_to_ptr.vmem [resolvable:$true] %s204_s4 }
  0x55   : > { %s727_s8 = scalar_lea.hbm %s976_s10, 256  ;;  %s702_s5 = scalar_lea.hbm %s1108_s1, 512 }
  0x56   : > { %p698_p7 = scmp.ne.s32.totalorder %s1005_s2, %s727_s8  ;;  %p703_p8 = scmp.lt.u32.totalorder %s1005_s2, %s1108_s1 }
  0x57   : > { %p704_p9 = scmp.lt.u32.totalorder %s702_s5, %s727_s8  ;;  %p706_p0 = scmp.lt.u32.totalorder %s727_s8, %s1005_s2 }
  0x58   : > { %p700_p4 = pnand %p698_p7, %p669_p3 }
  0x59   : > { %p705_p12 = por %p704_p9, %p703_p8 }
  0x5a   : > { %p701_p6 = pneg %p700_p4 }
  0x5b   : > { %p707_p5 = por %p706_p0, %p705_p12 }
  0x5d   : > { %p708_p10 = pnand %p707_p5, %p701_p6 }
  0x5f   : > { %711 = shalt.err (!%p708_p10)
}
  0x60   : > { %s712_s24 = scalar_lea.vmem %s205_s4, 128  ;;  %s822_s10 = smov [#allocation6]  }
  0x61   : > { %p713_p1 = scmp.ne.s32.totalorder %s205_s4, %s712_s24  ;;  %s717_s11 = sshll.u32 %s822_s10, 4  ;;  %s718_s11 = int_to_ptr.vmem [resolvable:$false] %s717_s11 }
  0x62   : > { %s719_s9 = scalar_lea.vmem %s718_s11, 256  ;;  %p720_p4 = scmp.lt.s32.totalorder %s205_s4, %s718_s11 }
  0x63   : > { %p715_p2 = pnand %p713_p1, %p669_p3  ;;  %p721_p13 = scmp.lt.s32.totalorder %s719_s9, %s712_s24 }
  0x65   : > { %p716_p7 = pneg %p715_p2  ;;  %p722_p8 = por %p721_p13, %p720_p4 }
  0x67   : > { %p723_p9 = pnand %p722_p8, %p716_p7 }
  0x69   : > { %726 = shalt.err (!%p723_p9)
}
  0x6a   : > { %574 = dma.hbm_to_vmem [thread:$0]  (!%p969_p11), %s1005_s2, 128, %s205_s4, %s191_s6  }
  0x6b   : > { %p1128_p6 = scmp.ne.s32.totalorder %s1119_s22, 0 }
  0x6c   : > { %s1032_s26 = sand.u32 (!%p1128_p6), 1, %s802_s13   ;;  %p1129_p13 = scmp.ne.s32.totalorder (!%p1128_p6), %s1117_s20, 0 }
  0x6d   : > { %213 = sbr.rel (%p1128_p6) target bundleno = 486 (0x1e6), region = 32  ;;  %s1035_s30 = sshll.u32 (!%p1128_p6), %s1032_s26, 3 }
  0x6e   : > { %s216_s8 = scalar_lea.sflag (!%p1128_p6), [#allocation4], %s1032_s26  ;;  %s219_s25 = scalar_lea.vmem (!%p1128_p6), [#allocation3], %s1035_s30 }
  0x74   : > { %781 = dma.done.wait (%p1129_p13), %s216_s8, 128  }
  0x75   : > { %783 = vsyncadd (%p1129_p13), %s216_s8, 4294967168  ;;  %s224_s22 = sand.u32 1, %s882_s18   ;;  %s228_s2 = scalar_lea.vmem [#allocation6], %s1035_s30 }
  0x76   : > { %s225_s27 = scalar_lea.sflag [#allocation7], %s224_s22 }
  0x77   : > { %785 = dma.done.wait (%p1129_p13), %s225_s27, 128  }
  0x78   : > { %787 = vsyncadd (%p1129_p13), %s225_s27, 4294967168  ;;  %p1130_p11 = scmp.eq.s32.totalorder %s882_s18, 0 }
  0x7a   : > { %789 = dma.done.wait (%p1130_p11), [#allocation7], 128   ;;  %p1131_p3 = pmov %p1130_p11 }
  0x7b   : > { %v823_v0 = vmov 0.0|0.0   ;;  %v824_v1 = vmov 1.0   ;;  %v264_v2 = vld [vmem:[%s219_s25] sm:$0xff]  ;;  %s825_s4 = smov 127   ;;  %s826_s6 = smov 126   ;;  %v271_v3 = vld [vmem:[%s228_s2] sm:$0xff] }
  0x7c   : > { %791 = vsyncadd (%p1131_p3), [#allocation7], 4294967168  ;;  %547 = vmatprep.subr.bf16.mxu0 %v823_v0  ;;  %261 = vst [vmem:[#allocation2 + $0x18] sm:$0x1] %v824_v1  ;;  %266 = vrot.lane.b32.xlu0 %v264_v2, %s825_s4  ;;  %vm827_vm0 = vmmov 0   ;;  %v828_v4 = vmov 0.0  }
  0x7d   : > { %280 = vrot.lane.b32.xlu1 %v264_v2, %s826_s6  ;;  %544 = vmatprep.mubr.msk.f32.mxu0 %vm827_vm0, %v828_v4  ;;  %vm269_vm1 = vcmask 1039360   ;;  %vm283_vm2 = vcmask 1031168   ;;  %vm276_vm3 = vcmask 1048568   ;;  %vm290_vm4 = vcmask 1048560   ;;  %v292_v14 = vld [vmem:[#allocation8] sm:$0xff]  ;;  %s259_s18 = scalar_lea.vmem [#allocation9], %s1035_s30 }
  0x7e   : > { %vm301_vm5 = vcmask 1040384   ;;  %vm829_vm6 = vmmov 1   ;;  %vm297_vm8 = vcmask 203776   ;;  %s391_s20 = sshll.u32 %s259_s18, 4  ;;  %s526_s28 = sshll.u32 %s810_s15, 7  ;;  %s1055_s20 = int_to_ptr.vmem [resolvable:$true] %s391_s20 }
  0x7f   : > { %vm552_vm7 = vmpackc.low %vm301_vm5, %vm829_vm6  ;;  %s1060_s19 = scalar_lea.hbm %s1110_s3, %s526_s28  ;;  %s377_s24 = scalar_lea.sflag [#allocation5], %s1032_s26 }
  0x80   : > { %273 = vrot.lane.b32.xlu0 %v271_v3, %s825_s4  ;;  %s728_s10 = scalar_lea.vmem %s1055_s20, 128  ;;  %p1132_p0 = scmp.ne.s32.totalorder %s1126_s23, 0 }
  0x81   : > { %287 = vrot.lane.b32.xlu1 %v271_v3, %s826_s6  ;;  %p729_p12 = scmp.ne.s32.totalorder %s1055_s20, %s728_s10  ;;  %s830_s15 = smov [#allocation9]  }
  0x82   : > { %s732_s11 = sshll.u32 %s830_s15, 4  ;;  %s733_s11 = int_to_ptr.vmem [resolvable:$false] %s732_s11 }
  0x83   : > { %v296_v11 = vld [vmem:[#allocation2 + $0x18] sm:$0x1]  ;;  %p730_p5 = pnand %p729_p12, %p1132_p0  ;;  %s734_s9 = scalar_lea.vmem %s733_s11, 256 }
  0x84   : > { %p735_p1 = scmp.lt.s32.totalorder %s1055_s20, %s733_s11  ;;  %p736_p2 = scmp.lt.s32.totalorder %s734_s9, %s728_s10 }
  0x85   : > { %p731_p10 = pneg %p730_p5 }
  0x86   : > { %p737_p7 = por %p736_p2, %p735_p1 }
  0x88   : > { %p738_p4 = pnand %p737_p7, %p731_p10 }
  0xee   : > { %v267_v5 = vpop.permute.xlu0 %266 }
  0xef   : > { %v281_v6 = vpop.permute.xlu1 %280  ;;  %270 = vst.msk [vmem:[#allocation2 + $0x8] sm:$0xff] %vm269_vm1, %v267_v5 }
  0xf0   : > { %284 = vst.msk [vmem:[#allocation2 + $0x10] sm:$0xff] %vm283_vm2, %v281_v6 }
  0xf2   : > { %v274_v7 = vpop.permute.xlu0 %273 }
  0xf3   : > { %v288_v8 = vpop.permute.xlu1 %287  ;;  %277 = vst.msk [vmem:[#allocation2 + $0x8] sm:$0xff] %vm276_vm3, %v274_v7 }
  0xf4   : > { %291 = vst.msk [vmem:[#allocation2 + $0x10] sm:$0xff] %vm290_vm4, %v288_v8 }
  0xfa   : > { %v294_v9 = vld [vmem:[#allocation2 + $0x8] sm:$0xff] }
  0xfb   : > { %v295_v10 = vld [vmem:[#allocation2 + $0x10] sm:$0xff]  ;;  %v548_v12 = vpack.c.bf16 %v294_v9, %v264_v2 }
  0xfc   : > { %v551_v13 = vpack.c.bf16 %v296_v11, %v295_v10 }
  0xfd   : > { %549 = vmatpush3.bf16.msra.mxu0 %v548_v12 }
  0xfe   : > { %550 = vmatprep.subr.bf16.mxu0 %v823_v0 }
 0x101   : > { %553 = vmatpush3.bf16.msk.msra.mxu0 %vm552_vm7, %v551_v13 }
 0x104   : > { %545 = vmatmul.mubr.msk.f32.vlgmr.msra.gmra.mrb[0].mxu0 %vm297_vm8, %v292_v14 }
 0x1d7   : > { %v371_v15 = vpop.f32.mrb[0].mxu0 }
 0x1d8   : > { %375 = vst [vmem:[%s259_s18] sm:$0xff] %v371_v15  ;;  %v546_v16 = vpop.f32.mrb[1].mxu0 }
 0x1d9   : > { %741 = shalt.err (!%p738_p4)
}
 0x1da   : > { %s742_s26 = scalar_lea.hbm %s1060_s19, 128  ;;  %s746_s25 = scalar_lea.hbm %s1110_s3, 256 }
 0x1db   : > { %p743_p8 = scmp.ne.s32.totalorder %s1060_s19, %s742_s26  ;;  %p747_p13 = scmp.lt.u32.totalorder %s1060_s19, %s1110_s3 }
 0x1dc   : > { %p748_p11 = scmp.lt.u32.totalorder %s746_s25, %s742_s26  ;;  %p750_p12 = scmp.lt.u32.totalorder %s742_s26, %s1060_s19 }
 0x1dd   : > { %p744_p9 = pnand %p743_p8, %p1132_p0 }
 0x1de   : > { %p749_p3 = por %p748_p11, %p747_p13 }
 0x1df   : > { %p745_p6 = pneg %p744_p9 }
 0x1e0   : > { %p751_p5 = por %p750_p12, %p749_p3 }
 0x1e2   : > { %p752_p10 = pnand %p751_p5, %p745_p6 }
 0x1e4   : > { %755 = shalt.err (!%p752_p10)
}
 0x1e5   : > { %562 = dma.vmem_to_hbm [thread:$0]  (%p1132_p0), %s1055_s20, 128, %s1060_s19, %s377_s24  }
 0x1e6 PF: > { %s403_s2 = sand.u32 1, %s798_s12   ;;  %p1133_p1 = scmp.ne.s32.totalorder %s1118_s21, 0 }
 0x1e7   : > { %p1134_p2 = scmp.ge.s32.totalorder %s818_s17, 2  ;;  %s404_s4 = scalar_lea.sflag [#allocation5], %s403_s2 }
 0x1e9   : > { %p576_p7 = pnand %p1134_p2, %p1133_p1 }
 0x1eb   : > { %793 = dma.done.wait (!%p576_p7), %s404_s4, 128  }
 0x1ec   : > { %795 = vsyncadd (!%p576_p7), %s404_s4, 4294967168  ;;  %s22_s17 = sadd.s32 1, %s818_s17   ;;  %s1135_s23 = sld [smem:[#allocation14_spill]] }
 0x1ed   : > { %p19_p4 = scmp.ge.s32.totalorder %s22_s17, 4   ;;  %s1136_s12 = smov %s802_s13 }
 0x1ee   : > { %s1137_s13 = smov %s806_s14  ;;  %s1138_s14 = smov %s956_s29 }
 0x1ef   : > { %s1139_s15 = smov %s814_s16  ;;  %21 = sbr.rel (!%p19_p4) target bundleno = 10 (0xa), region = 94 }
 0x1f2   : > { %s1140_s16 = smov %s1135_s23 }
 0x1f6   :  { %409 = vsyncpa [#allocation4], 1 }
 0x1f7   :  { %411 = vsyncpa [#allocation4 + $0x1], 1 }
 0x1f8   :  { %412 = vsyncpa [#allocation7], 1 }
 0x1f9   :  { %414 = vsyncpa [#allocation7 + $0x1], 1 }
 0x1fa   :  { %415 = vsyncpa [#allocation5], 1 }
 0x1fb   :  { %417 = vsyncpa [#allocation5 + $0x1], 1 }

</bundles_post_ra>
